<compile_context>
chip_gen: v6e
topology: v6e:2x2x1
jax: 0.10.0
libtpu: 0.0.40
codegen_flags: <defaults>
</compile_context>

<pallas_src>
import functools

import jax
import jax.numpy as jnp
import numpy as np
from jax import lax
from jax.experimental import pallas as pl
from jax.experimental.pallas import tpu as pltpu

_EPS = 1e-6
_LANE = 128
_SUBLANE = 8
_CHUNK_ROWS = 64                       # 8 f32 vregs per input chunk
_MAX_BLOCK_ROWS = 8192                 # 4 MiB per input tile
_VMEM_LIMIT_BYTES = 40 * 1024 * 1024   # headroom for 16 MiB of input buffers


def _focal_partial_kernel(pred_ref, gt_ref, out_ref, *,
                          block_rows, n_inner, n_tiles, full_rows, rem_lanes,
                          need_mask, unroll):
    """Accumulates [sum(pos_loss+neg_loss); num_pos] as two (8,128) lane slabs."""
    c = pl.program_id(0)
    i = pl.program_id(1)

    @pl.when(i == 0)
    def _():
        out_ref[...] = jnp.zeros_like(out_ref)

    n_chunks = block_rows // _CHUNK_ROWS

    def elementwise(pred, gt):
        # sigmoid via EUP exp + approx reciprocal (no Newton refinement).
        p = pl.reciprocal(1.0 + jnp.exp(-pred), approx=True)
        one_m_p = 1.0 - p
        one_m_gt = 1.0 - gt
        is_pos = gt == 1.0
        # kept (exact reference semantics for gt > 1); ~2 VPU ops/elem
        is_neg = (gt < 1.0).astype(jnp.float32)
        # One log per element: pos / neg branches are mutually exclusive.
        logv = jnp.log(jnp.where(is_pos, p + _EPS, one_m_p + _EPS))
        sq = one_m_gt * one_m_gt                               # (1 - gt)^2
        w = jnp.where(is_pos, one_m_p * one_m_p, p * p * sq * sq * is_neg)
        return logv * w, is_pos.astype(jnp.float32)

    def run(masked):
        if masked:
            row_base = (c * n_inner + i) * block_rows          # logical tile offset

        def body(j, carry):
            loss_acc, pos_acc = carry
            r0 = pl.multiple_of(j * _CHUNK_ROWS, _CHUNK_ROWS)
            pred = pred_ref[pl.ds(r0, _CHUNK_ROWS), :].astype(jnp.float32)
            gt = gt_ref[pl.ds(r0, _CHUNK_ROWS), :].astype(jnp.float32)
            loss_elem, pos_elem = elementwise(pred, gt)
            if masked:
                row_ids = row_base + r0 + lax.broadcasted_iota(
                    jnp.int32, (_CHUNK_ROWS, _LANE), 0)
                if rem_lanes == 0:
                    valid = row_ids < full_rows
                else:
                    lane_ids = lax.broadcasted_iota(
                        jnp.int32, (_CHUNK_ROWS, _LANE), 1)
                    valid = (row_ids < full_rows) | (
                        (row_ids == full_rows) & (lane_ids < rem_lanes))
                loss_elem = jnp.where(valid, loss_elem, 0.0)
                pos_elem = jnp.where(valid, pos_elem, 0.0)
            # (64,128) -> (8,128): leading-axis reduce = pure VPU vreg adds.
            loss_acc = loss_acc + jnp.sum(
                loss_elem.reshape(_CHUNK_ROWS // _SUBLANE, _SUBLANE, _LANE), axis=0)
            pos_acc = pos_acc + jnp.sum(
                pos_elem.reshape(_CHUNK_ROWS // _SUBLANE, _SUBLANE, _LANE), axis=0)
            return loss_acc, pos_acc

        init = (jnp.zeros((_SUBLANE, _LANE), jnp.float32),
                jnp.zeros((_SUBLANE, _LANE), jnp.float32))
        loss_acc, pos_acc = lax.fori_loop(0, n_chunks, body, init, unroll=unroll)
        out_ref[0:_SUBLANE, :] += loss_acc
        out_ref[_SUBLANE:2 * _SUBLANE, :] += pos_acc

    if not need_mask:
        # Every tile is full: no per-element masking anywhere.
        run(masked=False)
    else:
        tile_idx = c * n_inner + i                 # unclamped logical tile index
        row0 = tile_idx * block_rows
        tile_valid = tile_idx < n_tiles
        tile_full = tile_valid & ((row0 + block_rows) <= full_rows)

        @pl.when(tile_full)
        def _():
            run(masked=False)                      # fast path: no iota / select

        @pl.when(tile_valid & jnp.logical_not(tile_full))
        def _():
            run(masked=True)                       # at most one partial tile
        # Overflow tiles from the 2-core split (tile_idx >= n_tiles) skip compute.


@jax.jit
def centernet_focal_loss(pred, gt):
    """pred, gt: (B, C, H, W); pred are raw logits (as in the PyTorch module)."""
    assert pred.shape == gt.shape
    batch_size = pred.shape[0]
    total = pred.size

    chunk_elems = _CHUNK_ROWS * _LANE              # 8192
    padded_total = -(-total // chunk_elems) * chunk_elems

    pred_flat = pred.reshape(-1)
    gt_flat = gt.reshape(-1)
    if padded_total != total:
        pad = padded_total - total                 # < 8192 elems; masked in-kernel
        pred_flat = jnp.pad(pred_flat, (0, pad))
        gt_flat = jnp.pad(gt_flat, (0, pad))

    rows = padded_total // _LANE                   # multiple of _CHUNK_ROWS
    pred2d = pred_flat.reshape(rows, _LANE)
    gt2d = gt_flat.reshape(rows, _LANE)

    block_rows = min(_MAX_BLOCK_ROWS, rows)
    n_tiles = -(-rows // block_rows)
    n_outer = 2 if n_tiles >= 2 else 1             # v7x: feed both TensorCores
    n_inner = -(-n_tiles // n_outer)

    full_rows = total // _LANE
    rem_lanes = total % _LANE
    need_mask = (padded_total != total) or (n_outer * n_inner * block_rows != rows)

    n_chunks = block_rows // _CHUNK_ROWS
    unroll = next(u for u in (8, 4, 2, 1) if n_chunks % u == 0)

    def in_index(c, i):
        # Clamp overflow tiles to a valid block; their compute is skipped in-kernel.
        return (jnp.minimum(c * n_inner + i, n_tiles - 1), 0)

    kernel = functools.partial(
        _focal_partial_kernel,
        block_rows=block_rows, n_inner=n_inner, n_tiles=n_tiles,
        full_rows=full_rows, rem_lanes=rem_lanes, need_mask=need_mask,
        unroll=unroll)

    partials = pl.pallas_call(
        kernel,
        out_shape=jax.ShapeDtypeStruct((n_outer, 2 * _SUBLANE, _LANE), jnp.float32),
        grid_spec=pltpu.PrefetchScalarGridSpec(
            num_scalar_prefetch=0,
            grid=(n_outer, n_inner),
            in_specs=[
                pl.BlockSpec((block_rows, _LANE), in_index),
                pl.BlockSpec((block_rows, _LANE), in_index),
            ],
            out_specs=pl.BlockSpec((None, 2 * _SUBLANE, _LANE),
                                   lambda c, i: (c, 0, 0)),
        ),
        compiler_params=pltpu.CompilerParams(
            dimension_semantics=("parallel", "arbitrary"),
            vmem_limit_bytes=_VMEM_LIMIT_BYTES),
        cost_estimate=pl.CostEstimate(
            flops=25 * total, transcendentals=3 * total, bytes_accessed=8 * total),
    )(pred2d, gt2d)

    # Tiny final cross-lane reduction + scalar glue in plain JAX.
    loss_sum = jnp.sum(partials[:, :_SUBLANE, :])  # sum(pos_loss + neg_loss)
    num_pos = jnp.sum(partials[:, _SUBLANE:, :])

    loss = jnp.where(num_pos == 0.0, -loss_sum, -loss_sum / num_pos)
    return loss / batch_size


def _reference_focal_loss(pred, gt):
    """Pure-JAX port of the PyTorch _neg_loss for validation."""
    pred = pred.astype(jnp.float32)
    gt = gt.astype(jnp.float32)
    pos_inds = (gt == 1.0).astype(jnp.float32)
    neg_inds = (gt < 1.0).astype(jnp.float32)
    neg_weights = jnp.power(1.0 - gt, 4)
    p = jax.nn.sigmoid(pred)
    pos_loss = jnp.log(p + _EPS) * jnp.power(1.0 - p, 2) * pos_inds
    neg_loss = jnp.log(1.0 - p + _EPS) * jnp.power(p, 2) * neg_weights * neg_inds
    num_pos = pos_inds.sum()
    pos_loss = pos_loss.sum()
    neg_loss = neg_loss.sum()
    loss = jnp.where(num_pos == 0.0, -neg_loss, -(pos_loss + neg_loss) / num_pos)
    return loss / pred.shape[0]


if __name__ == "__main__":
    key = jax.random.PRNGKey(0)

    def make_case(k, shape, pos_frac):
        k1, k2 = jax.random.split(k)
        pred = jax.random.normal(k1, shape, dtype=jnp.float32)
        u = jax.random.uniform(k2, shape, dtype=jnp.float32)
        if pos_frac > 0.0:
            gt = jnp.where(u > 1.0 - pos_frac, jnp.float32(1.0), u * 0.9)
        else:
            gt = u * 0.9  # no exact-1 peaks -> num_pos == 0 branch
        return pred, gt

    cases = [
        ((2, 4, 16, 16), 0.03),      # main small case (padding + masked tail)
        ((1, 3, 7, 9), 0.05),        # ragged: flat pad + tail-lane mask
        ((1, 4, 128, 128), 0.02),    # no padding, exact tile -> unmasked fast path
        ((1, 2, 8200, 128), 0.01),   # multi-tile, 2-core split, overflow + partial tile
        ((2, 4, 16, 16), 0.0),       # num_pos == 0 branch
    ]

    for shape, frac in cases:
        key, sub = jax.random.split(key)
        pred, gt = make_case(sub, shape, frac)
        out = jax.block_until_ready(centernet_focal_loss(pred, gt))
        ref = jax.block_until_ready(_reference_focal_loss(pred, gt))
        # Tolerance covers the approximate (EUP) reciprocal used for the sigmoid.
        np.testing.assert_allclose(np.asarray(out), np.asarray(ref),
                                   rtol=2e-3, atol=1e-5)

    print("KERNEL_OK")
</pallas_src>

<mosaic_0001>
module attributes {stable_mosaic.version = 11 : i64} {
  func.func @_focal_partial_kernel(%arg0: i32, %arg1: i32, %arg2: memref<64x128xf32, #tpu.memory_space<vmem>>, %arg3: memref<64x128xf32, #tpu.memory_space<vmem>>, %arg4: memref<1x16x128xf32, #tpu.memory_space<vmem>>) attributes {dimension_semantics = [#tpu.dimension_semantics<parallel>, #tpu.dimension_semantics<arbitrary>], iteration_bounds = array<i64: 1, 1>, scalar_prefetch = 0 : i64, scratch_operands = 0 : i64, tpu.core_type = #tpu.core_type<tc>, window_params = [{transform_indices = @transform_0, window_bounds = array<i64: 64, 128>}, {transform_indices = @transform_1, window_bounds = array<i64: 64, 128>}, {transform_indices = @transform_2, window_bounds = array<i64: 1, 16, 128>}]} {
    %c0_i32 = arith.constant 0 : i32
    %0 = arith.cmpi eq, %arg1, %c0_i32 : i32
    %1 = arith.extui %0 : i1 to i32
    %c0_i32_0 = arith.constant 0 : i32
    %2 = arith.cmpi ne, %1, %c0_i32_0 : i32
    scf.if %2 {
      %cst = arith.constant 0.000000e+00 : f32
      %16 = vector.broadcast %cst : f32 to vector<16x128xf32>
      %c0 = arith.constant 0 : index
      %c0_5 = arith.constant 0 : index
      %c0_6 = arith.constant 0 : index
      %17 = vector.load %arg4[%c0, %c0_5, %c0_6] : memref<1x16x128xf32, #tpu.memory_space<vmem>>, vector<1x16x128xf32>
      %18 = vector.shape_cast %17 : vector<1x16x128xf32> to vector<16x128xf32>
      %19 = vector.shape_cast %16 : vector<16x128xf32> to vector<1x16x128xf32>
      tpu.vector_store %arg4[%c0, %c0_5, %c0_6], %19 {strides = array<i32>} : memref<1x16x128xf32, #tpu.memory_space<vmem>>, vector<1x16x128xf32>,
    } else {
    }
    %c1_i32 = arith.constant 1 : i32
    %3 = arith.muli %arg0, %c1_i32 : i32
    %4 = arith.addi %3, %arg1 : i32
    %c64_i32 = arith.constant 64 : i32
    %5 = arith.muli %4, %c64_i32 : i32
    %c1_i32_1 = arith.constant 1 : i32
    %6 = arith.cmpi slt, %4, %c1_i32_1 : i32
    %c64_i32_2 = arith.constant 64 : i32
    %7 = arith.addi %5, %c64_i32_2 : i32
    %c16_i32 = arith.constant 16 : i32
    %8 = arith.cmpi sle, %7, %c16_i32 : i32
    %9 = arith.andi %6, %8 : i1
    %10 = arith.extui %9 : i1 to i32
    %c0_i32_3 = arith.constant 0 : i32
    %11 = arith.cmpi ne, %10, %c0_i32_3 : i32
    scf.if %11 {
      %cst = arith.constant 0.000000e+00 : f32
      %16 = vector.broadcast %cst : f32 to vector<8x128xf32>
      %cst_5 = arith.constant 0.000000e+00 : f32
      %17 = vector.broadcast %cst_5 : f32 to vector<8x128xf32>
      %c0_i32_6 = arith.constant 0 : i32
      %c64_i32_7 = arith.constant 64 : i32
      %18 = arith.muli %c0_i32_6, %c64_i32_7 : i32
      %19 = tpu.assume_multiple %18, 64 : i32
      %20 = arith.index_cast %19 : i32 to index
      %c0 = arith.constant 0 : index
      %21 = vector.load %arg2[%20, %c0] : memref<64x128xf32, #tpu.memory_space<vmem>>, vector<64x128xf32>
      %22 = arith.index_cast %19 : i32 to index
      %c0_8 = arith.constant 0 : index
      %23 = vector.load %arg3[%22, %c0_8] : memref<64x128xf32, #tpu.memory_space<vmem>>, vector<64x128xf32>
      %cst_9 = arith.constant 0.000000e+00 : f32
      %24 = vector.broadcast %cst_9 : f32 to vector<64x128xf32>
      %25 = arith.subf %24, %21 : vector<64x128xf32>
      %26 = math.exp %25 : vector<64x128xf32>
      %cst_10 = arith.constant 1.000000e+00 : f32
      %27 = vector.broadcast %cst_10 : f32 to vector<64x128xf32>
      %28 = arith.addf %27, %26 : vector<64x128xf32>
      %29 = tpu.reciprocal %28 {approx = true} : vector<64x128xf32> -> vector<64x128xf32>
      %cst_11 = arith.constant 1.000000e+00 : f32
      %30 = vector.broadcast %cst_11 : f32 to vector<64x128xf32>
      %31 = arith.subf %30, %29 : vector<64x128xf32>
      %cst_12 = arith.constant 1.000000e+00 : f32
      %32 = vector.broadcast %cst_12 : f32 to vector<64x128xf32>
      %33 = arith.subf %32, %23 : vector<64x128xf32>
      %cst_13 = arith.constant 1.000000e+00 : f32
      %34 = vector.broadcast %cst_13 : f32 to vector<64x128xf32>
      %35 = arith.cmpf oeq, %23, %34 : vector<64x128xf32>
      %cst_14 = arith.constant 1.000000e+00 : f32
      %36 = vector.broadcast %cst_14 : f32 to vector<64x128xf32>
      %37 = arith.cmpf olt, %23, %36 : vector<64x128xf32>
      %38 = arith.extui %37 : vector<64x128xi1> to vector<64x128xi32>
      %39 = arith.sitofp %38 : vector<64x128xi32> to vector<64x128xf32>
      %cst_15 = arith.constant 9.99999997E-7 : f32
      %40 = vector.broadcast %cst_15 : f32 to vector<64x128xf32>
      %41 = arith.addf %29, %40 : vector<64x128xf32>
      %cst_16 = arith.constant 9.99999997E-7 : f32
      %42 = vector.broadcast %cst_16 : f32 to vector<64x128xf32>
      %43 = arith.addf %31, %42 : vector<64x128xf32>
      %44 = arith.select %35, %41, %43 : vector<64x128xi1>, vector<64x128xf32>
      %45 = math.log %44 : vector<64x128xf32>
      %46 = arith.mulf %33, %33 : vector<64x128xf32>
      %47 = arith.mulf %31, %31 : vector<64x128xf32>
      %48 = arith.mulf %29, %29 : vector<64x128xf32>
      %49 = arith.mulf %48, %46 : vector<64x128xf32>
      %50 = arith.mulf %49, %46 : vector<64x128xf32>
      %51 = arith.mulf %50, %39 : vector<64x128xf32>
      %52 = arith.select %35, %47, %51 : vector<64x128xi1>, vector<64x128xf32>
      %53 = arith.mulf %45, %52 : vector<64x128xf32>
      %54 = arith.extui %35 : vector<64x128xi1> to vector<64x128xi32>
      %55 = arith.sitofp %54 : vector<64x128xi32> to vector<64x128xf32>
      %56 = vector.shape_cast %53 : vector<64x128xf32> to vector<8x8x128xf32>
      %cst_17 = arith.constant dense<0.000000e+00> : vector<8x128xf32>
      %57 = vector.multi_reduction <add>, %56, %cst_17 [0] : vector<8x8x128xf32> to vector<8x128xf32>
      %58 = arith.addf %16, %57 : vector<8x128xf32>
      %59 = vector.shape_cast %55 : vector<64x128xf32> to vector<8x8x128xf32>
      %cst_18 = arith.constant dense<0.000000e+00> : vector<8x128xf32>
      %60 = vector.multi_reduction <add>, %59, %cst_18 [0] : vector<8x8x128xf32> to vector<8x128xf32>
      %61 = arith.addf %17, %60 : vector<8x128xf32>
      %c1_i32_19 = arith.constant 1 : i32
      %c0_20 = arith.constant 0 : index
      %c0_21 = arith.constant 0 : index
      %c0_22 = arith.constant 0 : index
      %62 = vector.load %arg4[%c0_20, %c0_21, %c0_22] : memref<1x16x128xf32, #tpu.memory_space<vmem>>, vector<1x8x128xf32>
      %63 = vector.shape_cast %62 : vector<1x8x128xf32> to vector<8x128xf32>
      %64 = arith.addf %63, %58 : vector<8x128xf32>
      %c0_23 = arith.constant 0 : index
      %c0_24 = arith.constant 0 : index
      %c0_25 = arith.constant 0 : index
      %65 = vector.load %arg4[%c0_23, %c0_24, %c0_25] : memref<1x16x128xf32, #tpu.memory_space<vmem>>, vector<1x8x128xf32>
      %66 = vector.shape_cast %65 : vector<1x8x128xf32> to vector<8x128xf32>
      %67 = vector.shape_cast %64 : vector<8x128xf32> to vector<1x8x128xf32>
      tpu.vector_store %arg4[%c0_23, %c0_24, %c0_25], %67 {strides = array<i32>} : memref<1x16x128xf32, #tpu.memory_space<vmem>>, vector<1x8x128xf32>,
      %c0_26 = arith.constant 0 : index
      %c8 = arith.constant 8 : index
      %c0_27 = arith.constant 0 : index
      %68 = vector.load %arg4[%c0_26, %c8, %c0_27] : memref<1x16x128xf32, #tpu.memory_space<vmem>>, vector<1x8x128xf32>
      %69 = vector.shape_cast %68 : vector<1x8x128xf32> to vector<8x128xf32>
      %70 = arith.addf %69, %61 : vector<8x128xf32>
      %c0_28 = arith.constant 0 : index
      %c8_29 = arith.constant 8 : index
      %c0_30 = arith.constant 0 : index
      %71 = vector.load %arg4[%c0_28, %c8_29, %c0_30] : memref<1x16x128xf32, #tpu.memory_space<vmem>>, vector<1x8x128xf32>
      %72 = vector.shape_cast %71 : vector<1x8x128xf32> to vector<8x128xf32>
      %73 = vector.shape_cast %70 : vector<8x128xf32> to vector<1x8x128xf32>
      tpu.vector_store %arg4[%c0_28, %c8_29, %c0_30], %73 {strides = array<i32>} : memref<1x16x128xf32, #tpu.memory_space<vmem>>, vector<1x8x128xf32>,
    } else {
    }
    %true = arith.constant true
    %12 = arith.xori %9, %true : i1
    %13 = arith.andi %6, %12 : i1
    %14 = arith.extui %13 : i1 to i32
    %c0_i32_4 = arith.constant 0 : i32
    %15 = arith.cmpi ne, %14, %c0_i32_4 : i32
    scf.if %15 {
      %c1_i32_5 = arith.constant 1 : i32
      %16 = arith.muli %arg0, %c1_i32_5 : i32
      %17 = arith.addi %16, %arg1 : i32
      %c64_i32_6 = arith.constant 64 : i32
      %18 = arith.muli %17, %c64_i32_6 : i32
      %cst = arith.constant 0.000000e+00 : f32
      %19 = vector.broadcast %cst : f32 to vector<8x128xf32>
      %cst_7 = arith.constant 0.000000e+00 : f32
      %20 = vector.broadcast %cst_7 : f32 to vector<8x128xf32>
      %c0_i32_8 = arith.constant 0 : i32
      %c64_i32_9 = arith.constant 64 : i32
      %21 = arith.muli %c0_i32_8, %c64_i32_9 : i32
      %22 = tpu.assume_multiple %21, 64 : i32
      %23 = arith.index_cast %22 : i32 to index
      %c0 = arith.constant 0 : index
      %24 = vector.load %arg2[%23, %c0] : memref<64x128xf32, #tpu.memory_space<vmem>>, vector<64x128xf32>
      %25 = arith.index_cast %22 : i32 to index
      %c0_10 = arith.constant 0 : index
      %26 = vector.load %arg3[%25, %c0_10] : memref<64x128xf32, #tpu.memory_space<vmem>>, vector<64x128xf32>
      %cst_11 = arith.constant 0.000000e+00 : f32
      %27 = vector.broadcast %cst_11 : f32 to vector<64x128xf32>
      %28 = arith.subf %27, %24 : vector<64x128xf32>
      %29 = math.exp %28 : vector<64x128xf32>
      %cst_12 = arith.constant 1.000000e+00 : f32
      %30 = vector.broadcast %cst_12 : f32 to vector<64x128xf32>
      %31 = arith.addf %30, %29 : vector<64x128xf32>
      %32 = tpu.reciprocal %31 {approx = true} : vector<64x128xf32> -> vector<64x128xf32>
      %cst_13 = arith.constant 1.000000e+00 : f32
      %33 = vector.broadcast %cst_13 : f32 to vector<64x128xf32>
      %34 = arith.subf %33, %32 : vector<64x128xf32>
      %cst_14 = arith.constant 1.000000e+00 : f32
      %35 = vector.broadcast %cst_14 : f32 to vector<64x128xf32>
      %36 = arith.subf %35, %26 : vector<64x128xf32>
      %cst_15 = arith.constant 1.000000e+00 : f32
      %37 = vector.broadcast %cst_15 : f32 to vector<64x128xf32>
      %38 = arith.cmpf oeq, %26, %37 : vector<64x128xf32>
      %cst_16 = arith.constant 1.000000e+00 : f32
      %39 = vector.broadcast %cst_16 : f32 to vector<64x128xf32>
      %40 = arith.cmpf olt, %26, %39 : vector<64x128xf32>
      %41 = arith.extui %40 : vector<64x128xi1> to vector<64x128xi32>
      %42 = arith.sitofp %41 : vector<64x128xi32> to vector<64x128xf32>
      %cst_17 = arith.constant 9.99999997E-7 : f32
      %43 = vector.broadcast %cst_17 : f32 to vector<64x128xf32>
      %44 = arith.addf %32, %43 : vector<64x128xf32>
      %cst_18 = arith.constant 9.99999997E-7 : f32
      %45 = vector.broadcast %cst_18 : f32 to vector<64x128xf32>
      %46 = arith.addf %34, %45 : vector<64x128xf32>
      %47 = arith.select %38, %44, %46 : vector<64x128xi1>, vector<64x128xf32>
      %48 = math.log %47 : vector<64x128xf32>
      %49 = arith.mulf %36, %36 : vector<64x128xf32>
      %50 = arith.mulf %34, %34 : vector<64x128xf32>
      %51 = arith.mulf %32, %32 : vector<64x128xf32>
      %52 = arith.mulf %51, %49 : vector<64x128xf32>
      %53 = arith.mulf %52, %49 : vector<64x128xf32>
      %54 = arith.mulf %53, %42 : vector<64x128xf32>
      %55 = arith.select %38, %50, %54 : vector<64x128xi1>, vector<64x128xf32>
      %56 = arith.mulf %48, %55 : vector<64x128xf32>
      %57 = arith.extui %38 : vector<64x128xi1> to vector<64x128xi32>
      %58 = arith.sitofp %57 : vector<64x128xi32> to vector<64x128xf32>
      %59 = arith.addi %18, %22 : i32
      %60 = tpu.iota {dimensions = array<i32: 0>} : vector<64x128xi32>
      %61 = vector.broadcast %59 : i32 to vector<64x128xi32>
      %62 = arith.addi %61, %60 : vector<64x128xi32>
      %c16_i32_19 = arith.constant 16 : i32
      %63 = vector.broadcast %c16_i32_19 : i32 to vector<64x128xi32>
      %64 = arith.cmpi slt, %62, %63 : vector<64x128xi32>
      %cst_20 = arith.constant 0.000000e+00 : f32
      %65 = vector.broadcast %cst_20 : f32 to vector<64x128xf32>
      %66 = arith.select %64, %56, %65 : vector<64x128xi1>, vector<64x128xf32>
      %cst_21 = arith.constant 0.000000e+00 : f32
      %67 = vector.broadcast %cst_21 : f32 to vector<64x128xf32>
      %68 = arith.select %64, %58, %67 : vector<64x128xi1>, vector<64x128xf32>
      %69 = vector.shape_cast %66 : vector<64x128xf32> to vector<8x8x128xf32>
      %cst_22 = arith.constant dense<0.000000e+00> : vector<8x128xf32>
      %70 = vector.multi_reduction <add>, %69, %cst_22 [0] : vector<8x8x128xf32> to vector<8x128xf32>
      %71 = arith.addf %19, %70 : vector<8x128xf32>
      %72 = vector.shape_cast %68 : vector<64x128xf32> to vector<8x8x128xf32>
      %cst_23 = arith.constant dense<0.000000e+00> : vector<8x128xf32>
      %73 = vector.multi_reduction <add>, %72, %cst_23 [0] : vector<8x8x128xf32> to vector<8x128xf32>
      %74 = arith.addf %20, %73 : vector<8x128xf32>
      %c1_i32_24 = arith.constant 1 : i32
      %c0_25 = arith.constant 0 : index
      %c0_26 = arith.constant 0 : index
      %c0_27 = arith.constant 0 : index
      %75 = vector.load %arg4[%c0_25, %c0_26, %c0_27] : memref<1x16x128xf32, #tpu.memory_space<vmem>>, vector<1x8x128xf32>
      %76 = vector.shape_cast %75 : vector<1x8x128xf32> to vector<8x128xf32>
      %77 = arith.addf %76, %71 : vector<8x128xf32>
      %c0_28 = arith.constant 0 : index
      %c0_29 = arith.constant 0 : index
      %c0_30 = arith.constant 0 : index
      %78 = vector.load %arg4[%c0_28, %c0_29, %c0_30] : memref<1x16x128xf32, #tpu.memory_space<vmem>>, vector<1x8x128xf32>
      %79 = vector.shape_cast %78 : vector<1x8x128xf32> to vector<8x128xf32>
      %80 = vector.shape_cast %77 : vector<8x128xf32> to vector<1x8x128xf32>
      tpu.vector_store %arg4[%c0_28, %c0_29, %c0_30], %80 {strides = array<i32>} : memref<1x16x128xf32, #tpu.memory_space<vmem>>, vector<1x8x128xf32>,
      %c0_31 = arith.constant 0 : index
      %c8 = arith.constant 8 : index
      %c0_32 = arith.constant 0 : index
      %81 = vector.load %arg4[%c0_31, %c8, %c0_32] : memref<1x16x128xf32, #tpu.memory_space<vmem>>, vector<1x8x128xf32>
      %82 = vector.shape_cast %81 : vector<1x8x128xf32> to vector<8x128xf32>
      %83 = arith.addf %82, %74 : vector<8x128xf32>
      %c0_33 = arith.constant 0 : index
      %c8_34 = arith.constant 8 : index
      %c0_35 = arith.constant 0 : index
      %84 = vector.load %arg4[%c0_33, %c8_34, %c0_35] : memref<1x16x128xf32, #tpu.memory_space<vmem>>, vector<1x8x128xf32>
      %85 = vector.shape_cast %84 : vector<1x8x128xf32> to vector<8x128xf32>
      %86 = vector.shape_cast %83 : vector<8x128xf32> to vector<1x8x128xf32>
      tpu.vector_store %arg4[%c0_33, %c8_34, %c0_35], %86 {strides = array<i32>} : memref<1x16x128xf32, #tpu.memory_space<vmem>>, vector<1x8x128xf32>,
    } else {
    }
    return
  }
  func.func @transform_0(%arg0: i32, %arg1: i32) -> (i32, i32) {
    %c1_i32 = arith.constant 1 : i32
    %0 = arith.muli %arg0, %c1_i32 : i32
    %1 = arith.addi %0, %arg1 : i32
    %c0_i32 = arith.constant 0 : i32
    %2 = arith.minsi %1, %c0_i32 : i32
    %c0_i32_0 = arith.constant 0 : i32
    %c0_i32_1 = arith.constant 0 : i32
    return %2, %c0_i32_0 : i32, i32
  }
  func.func @transform_1(%arg0: i32, %arg1: i32) -> (i32, i32) {
    %c1_i32 = arith.constant 1 : i32
    %0 = arith.muli %arg0, %c1_i32 : i32
    %1 = arith.addi %0, %arg1 : i32
    %c0_i32 = arith.constant 0 : i32
    %2 = arith.minsi %1, %c0_i32 : i32
    %c0_i32_0 = arith.constant 0 : i32
    %c0_i32_1 = arith.constant 0 : i32
    return %2, %c0_i32_0 : i32, i32
  }
  func.func @transform_2(%arg0: i32, %arg1: i32) -> (i32, i32, i32) {
    %c0_i32 = arith.constant 0 : i32
    %c0_i32_0 = arith.constant 0 : i32
    %c0_i32_1 = arith.constant 0 : i32
    return %arg0, %c0_i32, %c0_i32_0 : i32, i32, i32
  }
}

</mosaic_0001>

<bundles_post_ra>
// kernel: centernet_focal_loss.1
= control target key start
LH: loop header
LB: loop body
LE: loop exit
PB: predicated region body
PF: predicated region fallthrough
CT: control target
= control target key end

     0   :  { %v691_v8 = vmov 0.0   ;;  %s731_s0 = inlined_call_operand.vmem [shape: f32[64,128], index: 0, kind: input, shape index: {}]   ;;  %s732_s1 = inlined_call_operand.vmem [shape: f32[64,128], index: 1, kind: input, shape index: {}]   ;;  %s733_s2 = inlined_call_operand.vmem [shape: f32[1,16,128], index: 2, kind: output, shape index: {}]  }
   0x1   :  { %v341_v0 = vld [vmem:[%s731_s0] sm:$0xff]  ;;  %v342_v1 = vld [vmem:[%s731_s0 + $0x8] sm:$0xff] }
   0x2   :  { %v349_v2 = vld [vmem:[%s732_s1] sm:$0xff]  ;;  %v350_v3 = vld [vmem:[%s732_s1 + $0x8] sm:$0xff]  ;;  %v357_v4 = vsub.f32 0.0, %v341_v0  ;;  %v358_v5 = vsub.f32 0.0, %v342_v1 }
   0x3   :  { %vm413_vm0 = vcmp.eq.f32.partialorder %v349_v2, 1.0  ;;  %vm414_vm1 = vcmp.eq.f32.partialorder %v350_v3, 1.0  ;;  %v405_v16 = vsub.f32 1.0, %v349_v2  ;;  %v406_v18 = vsub.f32 1.0, %v350_v3 }
   0x4   :  { %v365_v6 = vmul.f32 1.442695, %v357_v4  ;;  %v367_v7 = vmul.f32 1.442695, %v358_v5  ;;  %v670_v9 = vsel %vm413_vm0, 1.0, %v691_v8  ;;  %v671_v10 = vsel %vm414_vm1, 1.0, %v691_v8 }
   0x5   :  { %v616_v11 = vadd.f32 %v671_v10, %v670_v9  ;;  %v485_v25 = vmul.f32 %v405_v16, %v405_v16  ;;  %v486_v28 = vmul.f32 %v406_v18, %v406_v18  ;;  %vm421_vm2 = vcmp.lt.f32.partialorder %v349_v2, 1.0 }
   0x6   :  { %679 = vpow2.f32 %v365_v6  ;;  %vm422_vm3 = vcmp.lt.f32.partialorder %v350_v3, 1.0  ;;  %v662_v35 = vsel %vm421_vm2, 1.0, %v691_v8 }
   0x7   :  { %681 = vpow2.f32 %v367_v7  ;;  %629 = vst [vmem:[%s733_s2 + $0x8] sm:$0xff] %v616_v11  ;;  %v663_v37 = vsel %vm422_vm3, 1.0, %v691_v8 }
  0x13   :  { %v680_v12 = vpop.eup %679 }
  0x14   :  { %v682_v13 = vpop.eup %681  ;;  %v381_v14 = vadd.f32 1.0, %v680_v12 }
  0x15   :  { %v382_v15 = vadd.f32 1.0, %v682_v13 }
  0x16   :  { %683 = vrcp.f32 %v381_v14 }
  0x17   :  { %685 = vrcp.f32 %v382_v15 }
  0x23   :  { %v684_v17 = vpop.eup %683 }
  0x24   :  { %v686_v19 = vpop.eup %685  ;;  %v397_v20 = vsub.f32 1.0, %v684_v17  ;;  %v445_v21 = vadd.f32 1e-06, %v684_v17  ;;  %v501_v26 = vmul.f32 %v684_v17, %v684_v17 }
  0x25   :  { %v398_v22 = vsub.f32 1.0, %v686_v19  ;;  %v446_v23 = vadd.f32 1e-06, %v686_v19  ;;  %v502_v29 = vmul.f32 %v686_v19, %v686_v19 }
  0x26   :  { %v453_v24 = vadd.f32 1e-06, %v397_v20  ;;  %v509_v32 = vmul.f32 %v501_v26, %v485_v25  ;;  %v493_v38 = vmul.f32 %v397_v20, %v397_v20 }
  0x27   :  { %v454_v27 = vadd.f32 1e-06, %v398_v22  ;;  %v510_v33 = vmul.f32 %v502_v29, %v486_v28  ;;  %v494_v40 = vmul.f32 %v398_v22, %v398_v22 }
  0x28   :  { %v461_v30 = vsel %vm413_vm0, %v445_v21, %v453_v24  ;;  %v517_v34 = vmul.f32 %v509_v32, %v485_v25 }
  0x29   :  { %v462_v31 = vsel %vm414_vm1, %v446_v23, %v454_v27  ;;  %687 = vlog2.f32 %v461_v30  ;;  %v518_v36 = vmul.f32 %v510_v33, %v486_v28 }
  0x2a   :  { %689 = vlog2.f32 %v462_v31  ;;  %v525_v39 = vmul.f32 %v662_v35, %v517_v34 }
  0x2b   :  { %v526_v41 = vmul.f32 %v663_v37, %v518_v36 }
  0x2c   :  { %v533_v43 = vsel %vm413_vm0, %v493_v38, %v525_v39 }
  0x2d   :  { %v534_v46 = vsel %vm414_vm1, %v494_v40, %v526_v41 }
  0x36   :  { %v688_v42 = vpop.eup %687 }
  0x37   :  { %v690_v44 = vpop.eup %689  ;;  %v470_v45 = vmul.f32 0.6931472, %v688_v42 }
  0x38   :  { %v472_v47 = vmul.f32 0.6931472, %v690_v44 }
  0x39   :  { %v541_v48 = vmul.f32 %v533_v43, %v470_v45 }
  0x3a   :  { %v542_v49 = vmul.f32 %v534_v46, %v472_v47 }
  0x3c   :  { %v608_v50 = vadd.f32 %v542_v49, %v541_v48 }
  0x3e   :  { %626 = vst [vmem:[%s733_s2] sm:$0xff] %v608_v50 }

</bundles_post_ra>
